<compile_context>
chip_gen: v6e
topology: v6e:2x2x1
jax: 0.10.0
libtpu: 0.0.40
codegen_flags: <defaults>
</compile_context>

<pallas_src>
import numpy as np
import jax
import jax.numpy as jnp
from jax.experimental import pallas as pl
from jax.experimental.pallas import tpu as pltpu

# ---------------- synthetic problem sizes (scaled-down but structurally faithful) ----
BATCH = 2
IN_CH = 3
IMG_H = IMG_W = 32          # full image
CROP = 16                   # crop_size (1024 in the original)
STRIDE = 12                 # stride    (768 in the original)  -> overlapping windows
OUT_CH = 19                 # segmentation classes
PATCH = 4                   # synthetic backbone downsample factor (head is 1/4 res)

HS = WS = CROP // PATCH     # head spatial resolution inside one crop (4 x 4)
NROW = HS * WS              # im2col rows per (window, batch element) = 16
K_RAW = IN_CH * PATCH * PATCH   # im2col features = 48
KPAD = 128                  # contraction dim padded to a lane-aligned multiple
CPAD = 128                  # channel dim padded to a full lane width (19 -> 128)


# ---------------------------------------------------------------------------
# Host-side helpers (trace-time constants / glue)
# ---------------------------------------------------------------------------

def _interp_matrix(out_size, in_size):
    """Row-interpolation matrix matching F.interpolate(bilinear, align_corners=False)."""
    scale = in_size / out_size
    i = np.arange(out_size, dtype=np.float64)
    src = (i + 0.5) * scale - 0.5
    src = np.maximum(src, 0.0)                      # PyTorch clamps negative source coords
    x0 = np.floor(src).astype(np.int64)
    lam = (src - x0).astype(np.float32)
    x0 = np.clip(x0, 0, in_size - 1)
    x1 = np.clip(x0 + 1, 0, in_size - 1)
    m = np.zeros((out_size, in_size), np.float32)
    np.add.at(m, (np.arange(out_size), x0), 1.0 - lam)
    np.add.at(m, (np.arange(out_size), x1), lam)
    return m


def _slide_offsets(h_img, w_img, h_crop, w_crop, h_stride, w_stride):
    """Window (y1, x1) offsets exactly as in the reference slide-inference loop."""
    h_grids = max(h_img - h_crop + h_stride - 1, 0) // h_stride + 1
    w_grids = max(w_img - w_crop + w_stride - 1, 0) // w_stride + 1
    offs = []
    for h_idx in range(h_grids):
        for w_idx in range(w_grids):
            y1 = h_idx * h_stride
            x1 = w_idx * w_stride
            y2 = min(y1 + h_crop, h_img)
            x2 = min(x1 + w_crop, w_img)
            y1 = max(y2 - h_crop, 0)
            x1 = max(x2 - w_crop, 0)
            offs.append((y1, x1))
    return offs


# ---------------------------------------------------------------------------
# Fused Pallas kernel: per (batch, window) grid step
#   patch-embed matmul (bias folded in) -> count-scaled bilinear upsample (one matmul)
#   -> accumulate at (y1, x1) into the VMEM-resident image accumulator.
# ---------------------------------------------------------------------------

def _fused_window_kernel(y1_ref, x1_ref,              # scalar-prefetch (SMEM)
                         patch_ref, w_ref, m_ref,     # inputs (VMEM)
                         preds_ref):                  # resident output accumulator
    g = pl.program_id(1)                              # window axis (innermost, "arbitrary")

    @pl.when(g == 0)
    def _init():
        preds_ref[...] = jnp.zeros_like(preds_ref)

    # Synthetic patch-embed head (bias folded into an augmented ones column):
    # (NROW, KPAD) @ (KPAD, CPAD)  -- lane-dense, one MXU matmul.
    logits = jnp.dot(patch_ref[0, 0], w_ref[...], preferred_element_type=jnp.float32)

    # Bilinear upsample head-res -> crop-res as ONE matmul with the precomputed
    # per-window operator diag(1/count) @ kron(R_h, R_w): (CROP*CROP, NROW) @ (NROW, CPAD).
    # The 1/count_mat division of the reference is already baked into m_ref.
    up = jnp.dot(m_ref[0], logits, preferred_element_type=jnp.float32)
    up = up.reshape(CROP, CROP, CPAD)                 # (H_crop, W_crop, Cpad)

    # Accumulate the (already count-normalized) crop logits into the image-sized
    # accumulator at its window position (channels in lanes -> unmasked 128-wide stores).
    y1 = y1_ref[g]
    x1 = x1_ref[g]
    cur = preds_ref[0, pl.ds(y1, CROP), pl.ds(x1, CROP), :]
    preds_ref[0, pl.ds(y1, CROP), pl.ds(x1, CROP), :] = cur + up


def fused_slide_window(patches, w_aug, m_up_g, y1s, x1s, h_img, w_img):
    """patches: (G, B, NROW, KPAD); m_up_g: (G, CROP*CROP, NROW).
    Returns preds in NHWC lane-padded layout (B, H, W, CPAD)."""
    G, B, nrow, kpad = patches.shape
    return pl.pallas_call(
        _fused_window_kernel,
        out_shape=jax.ShapeDtypeStruct((B, h_img, w_img, CPAD), jnp.float32),
        grid_spec=pltpu.PrefetchScalarGridSpec(
            num_scalar_prefetch=2,                    # y1s, x1s -> SMEM
            grid=(B, G),                              # batch (parallel), window (reduction)
            in_specs=[
                pl.BlockSpec((1, 1, nrow, kpad),       lambda b, g, y1s, x1s: (g, b, 0, 0)),
                pl.BlockSpec((kpad, CPAD),             lambda b, g, y1s, x1s: (0, 0)),
                pl.BlockSpec((1, CROP * CROP, nrow),   lambda b, g, y1s, x1s: (g, 0, 0)),
            ],
            out_specs=pl.BlockSpec((1, h_img, w_img, CPAD),
                                   lambda b, g, y1s, x1s: (b, 0, 0, 0)),
        ),
        compiler_params=pltpu.CompilerParams(
            dimension_semantics=("parallel", "arbitrary")),
    )(y1s, x1s, patches, w_aug, m_up_g)


# ---------------------------------------------------------------------------
# Model (slide-window inference, mirroring MyModel.forward)
# ---------------------------------------------------------------------------

class MyModelPallas:
    def __init__(self, key):
        self.mode = "slide"
        self.crop_size = (CROP, CROP)
        self.stride = (STRIDE, STRIDE)
        self.out_channels = OUT_CH
        # TODO(synk): the real mmseg MiT-b0 backbone + SegFormer decode head come from
        # init_segmentor(config, checkpoint) and cannot be loaded here; they are replaced
        # by a deterministic stride-4 4x4 patch-embed head (conv-as-matmul) producing
        # out_channels logits at 1/4 crop resolution, so the slide-window forward path
        # (crop -> model -> bilinear up -> accumulate -> count -> divide -> resize)
        # is reproduced exactly.
        k1, k2 = jax.random.split(key)
        self.w_raw = jax.random.normal(k1, (K_RAW, OUT_CH), jnp.float32) / np.sqrt(K_RAW)
        self.b_raw = 0.01 * jax.random.normal(k2, (1, OUT_CH), jnp.float32)
        # Zero-pad weights to lane-dense 128-aligned shapes and fold the bias in as an
        # extra contraction row (matched by a ones column in the im2col matrix).
        w_aug = jnp.zeros((KPAD, CPAD), jnp.float32)
        w_aug = w_aug.at[:K_RAW, :OUT_CH].set(self.w_raw)
        w_aug = w_aug.at[K_RAW, :OUT_CH].set(self.b_raw[0])
        self.w_aug = w_aug
        # Base bilinear-upsample operator (head res -> crop res), built once.
        r_h = _interp_matrix(CROP, HS)                # (CROP, HS)
        r_w = _interp_matrix(CROP, WS)                # (CROP, WS)
        self.m_up = np.kron(r_h, r_w)                 # (CROP*CROP, HS*WS)

    def forward(self, input_tensor):
        h_stride, w_stride = self.stride
        h_crop, w_crop = self.crop_size
        batch_size, _, h_img, w_img = input_tensor.shape

        # Window offsets (trace-time constants, identical to the reference loop).
        offs = _slide_offsets(h_img, w_img, h_crop, w_crop, h_stride, w_stride)
        y1s = jnp.asarray([o[0] for o in offs], jnp.int32)
        x1s = jnp.asarray([o[1] for o in offs], jnp.int32)

        # count_mat is a trace-time constant -> fold 1/count directly into per-window
        # upsample operators: diag(1/count[window]) @ kron(R_h, R_w).
        cnt = np.zeros((h_img, w_img), np.float32)
        for (y1, x1) in offs:
            cnt[y1:y1 + h_crop, x1:x1 + w_crop] += 1.0
        inv = 1.0 / cnt
        m_ups = []
        for (y1, x1) in offs:
            inv_win = inv[y1:y1 + h_crop, x1:x1 + w_crop].reshape(-1)   # (CROP*CROP,)
            m_ups.append(inv_win[:, None] * self.m_up)
        m_up_g = jnp.asarray(np.stack(m_ups).astype(np.float32))        # (G, CROP*CROP, NROW)

        # im2col over ALL windows at once (glue): (G, B, HS*WS, KPAD), with a ones column
        # at index K_RAW to carry the bias through the matmul.
        mats = []
        for (y1, x1) in offs:
            crop = input_tensor[:, :, y1:y1 + h_crop, x1:x1 + w_crop]
            p = crop.reshape(batch_size, IN_CH, HS, PATCH, WS, PATCH)
            p = p.transpose(0, 2, 4, 1, 3, 5).reshape(batch_size, HS * WS, K_RAW)
            mats.append(p)
        patches = jnp.stack(mats)                                        # (G, B, 16, 48)
        patches = jnp.pad(patches, ((0, 0), (0, 0), (0, 0), (0, KPAD - K_RAW)))
        patches = patches.at[:, :, :, K_RAW].set(1.0)                    # bias column

        # One fused kernel for the whole slide-window inference.
        preds_nhwc = fused_slide_window(patches, self.w_aug, m_up_g, y1s, x1s,
                                        h_img, w_img)

        # Drop padded channels, return to NCHW.
        preds = jnp.transpose(preds_nhwc[:, :, :, :self.out_channels], (0, 3, 1, 2))

        # Final resize(preds, size=input.shape[2:], bilinear, align_corners=False) is an
        # exact identity here (preds already has the input spatial size) -> skipped.
        return preds


# ---------------------------------------------------------------------------
# Pure NumPy (float64) reference of the same forward pass, for a correctness check.
# ---------------------------------------------------------------------------

def _reference_forward(x, w, b):
    x = np.asarray(x, np.float64)
    w = np.asarray(w, np.float64)
    b = np.asarray(b, np.float64)
    B, _, h_img, w_img = x.shape
    preds = np.zeros((B, OUT_CH, h_img, w_img))
    cnt = np.zeros((B, 1, h_img, w_img))
    R = _interp_matrix(CROP, HS).astype(np.float64)
    C = _interp_matrix(CROP, WS).astype(np.float64)
    for (y1, x1) in _slide_offsets(h_img, w_img, CROP, CROP, STRIDE, STRIDE):
        crop = x[:, :, y1:y1 + CROP, x1:x1 + CROP]
        p = crop.reshape(B, IN_CH, HS, PATCH, WS, PATCH)
        p = p.transpose(0, 2, 4, 1, 3, 5).reshape(B, HS * WS, K_RAW)
        logit = p @ w + b                                   # (B, HS*WS, OUT_CH)
        logit = logit.reshape(B, HS, WS, OUT_CH).transpose(0, 3, 1, 2)
        up = np.einsum('Hh,bchw,Ww->bcHW', R, logit, C)     # bilinear upsample
        preds[:, :, y1:y1 + CROP, x1:x1 + CROP] += up
        cnt[:, :, y1:y1 + CROP, x1:x1 + CROP] += 1.0
    return preds / cnt


# ---------------------------------------------------------------------------

if __name__ == "__main__":
    key = jax.random.PRNGKey(0)
    k_in, k_model = jax.random.split(key)
    x = jax.random.normal(k_in, (BATCH, IN_CH, IMG_H, IMG_W), jnp.float32)

    model = MyModelPallas(k_model)
    out = model.forward(x)
    out = jax.block_until_ready(out)

    assert out.shape == (BATCH, OUT_CH, IMG_H, IMG_W), out.shape
    assert bool(jnp.all(jnp.isfinite(out)))

    ref = _reference_forward(np.asarray(x), np.asarray(model.w_raw), np.asarray(model.b_raw))
    assert np.allclose(np.asarray(out), ref, rtol=5e-2, atol=5e-2), \
        float(np.max(np.abs(np.asarray(out) - ref)))

    print("KERNEL_OK")
</pallas_src>

<mosaic_0001>
module attributes {stable_mosaic.version = 11 : i64} {
  func.func @_fused_window_kernel(%arg0: i32, %arg1: i32, %arg2: memref<9xi32, #tpu.memory_space<smem>>, %arg3: memref<9xi32, #tpu.memory_space<smem>>, %arg4: memref<1x1x16x128xf32, #tpu.memory_space<vmem>>, %arg5: memref<128x128xf32, #tpu.memory_space<vmem>>, %arg6: memref<1x256x16xf32, #tpu.memory_space<vmem>>, %arg7: memref<1x32x32x128xf32, #tpu.memory_space<vmem>>) attributes {dimension_semantics = [#tpu.dimension_semantics<parallel>, #tpu.dimension_semantics<arbitrary>], iteration_bounds = array<i64: 2, 9>, scalar_prefetch = 2 : i64, scratch_operands = 0 : i64, tpu.core_type = #tpu.core_type<tc>, window_params = [{transform_indices = @transform_0, window_bounds = array<i64: 1, 1, 16, 128>}, {pipeline_mode = #tpu.pipeline_mode<synchronous>, transform_indices = @transform_1, window_bounds = array<i64: 128, 128>}, {transform_indices = @transform_2, window_bounds = array<i64: 1, 256, 16>}, {transform_indices = @transform_3, window_bounds = array<i64: 1, 32, 32, 128>}]} {
    %c0_i32 = arith.constant 0 : i32
    %0 = arith.cmpi eq, %arg1, %c0_i32 : i32
    %1 = arith.extui %0 : i1 to i32
    %c0_i32_0 = arith.constant 0 : i32
    %2 = arith.cmpi ne, %1, %c0_i32_0 : i32
    scf.if %2 {
      %cst_14 = arith.constant 0.000000e+00 : f32
      %25 = vector.broadcast %cst_14 : f32 to vector<1x32x32x128xf32>
      %c0_15 = arith.constant 0 : index
      %c0_16 = arith.constant 0 : index
      %c0_17 = arith.constant 0 : index
      %c0_18 = arith.constant 0 : index
      %26 = vector.load %arg7[%c0_15, %c0_16, %c0_17, %c0_18] : memref<1x32x32x128xf32, #tpu.memory_space<vmem>>, vector<1x32x32x128xf32>
      tpu.vector_store %arg7[%c0_15, %c0_16, %c0_17, %c0_18], %25 {strides = array<i32>} : memref<1x32x32x128xf32, #tpu.memory_space<vmem>>, vector<1x32x32x128xf32>,
    } else {
    }
    %c0 = arith.constant 0 : index
    %c0_1 = arith.constant 0 : index
    %c0_2 = arith.constant 0 : index
    %c0_3 = arith.constant 0 : index
    %3 = vector.load %arg4[%c0, %c0_1, %c0_2, %c0_3] : memref<1x1x16x128xf32, #tpu.memory_space<vmem>>, vector<1x1x16x128xf32>
    %4 = vector.shape_cast %3 : vector<1x1x16x128xf32> to vector<16x128xf32>
    %c0_4 = arith.constant 0 : index
    %c0_5 = arith.constant 0 : index
    %5 = vector.load %arg5[%c0_4, %c0_5] : memref<128x128xf32, #tpu.memory_space<vmem>>, vector<128x128xf32>
    %cst = arith.constant dense<0.000000e+00> : vector<16x128xf32>
    %6 = tpu.matmul %4, %5, %cst {dimension_numbers = #tpu.dot_dimension_numbers<[1], [0], [0], [1], [0, 0, 1, 1], [], []>} : vector<16x128xf32>, vector<128x128xf32>, vector<16x128xf32> -> vector<16x128xf32>
    %c0_6 = arith.constant 0 : index
    %c0_7 = arith.constant 0 : index
    %c0_8 = arith.constant 0 : index
    %7 = vector.load %arg6[%c0_6, %c0_7, %c0_8] : memref<1x256x16xf32, #tpu.memory_space<vmem>>, vector<1x256x16xf32>
    %8 = vector.shape_cast %7 : vector<1x256x16xf32> to vector<256x16xf32>
    %cst_9 = arith.constant dense<0.000000e+00> : vector<256x128xf32>
    %9 = tpu.matmul %8, %6, %cst_9 {dimension_numbers = #tpu.dot_dimension_numbers<[1], [0], [0], [1], [0, 0, 1, 1], [], []>} : vector<256x16xf32>, vector<16x128xf32>, vector<256x128xf32> -> vector<256x128xf32>
    %10 = vector.shape_cast %9 : vector<256x128xf32> to vector<16x16x128xf32>
    %11 = arith.index_cast %arg1 : i32 to index
    %12 = memref.load %arg2[%11] : memref<9xi32, #tpu.memory_space<smem>>
    %13 = arith.index_cast %arg1 : i32 to index
    %14 = memref.load %arg3[%13] : memref<9xi32, #tpu.memory_space<smem>>
    %c0_10 = arith.constant 0 : index
    %15 = arith.index_cast %12 : i32 to index
    %16 = arith.index_cast %14 : i32 to index
    %c0_11 = arith.constant 0 : index
    %17 = vector.load %arg7[%c0_10, %15, %16, %c0_11] : memref<1x32x32x128xf32, #tpu.memory_space<vmem>>, vector<1x16x16x128xf32>
    %18 = vector.shape_cast %17 : vector<1x16x16x128xf32> to vector<16x16x128xf32>
    %19 = arith.addf %18, %10 : vector<16x16x128xf32>
    %c0_12 = arith.constant 0 : index
    %20 = arith.index_cast %12 : i32 to index
    %21 = arith.index_cast %14 : i32 to index
    %c0_13 = arith.constant 0 : index
    %22 = vector.load %arg7[%c0_12, %20, %21, %c0_13] : memref<1x32x32x128xf32, #tpu.memory_space<vmem>>, vector<1x16x16x128xf32>
    %23 = vector.shape_cast %22 : vector<1x16x16x128xf32> to vector<16x16x128xf32>
    %24 = vector.shape_cast %19 : vector<16x16x128xf32> to vector<1x16x16x128xf32>
    tpu.vector_store %arg7[%c0_12, %20, %21, %c0_13], %24 {strides = array<i32>} : memref<1x32x32x128xf32, #tpu.memory_space<vmem>>, vector<1x16x16x128xf32>,
    return
  }
  func.func @transform_0(%arg0: i32, %arg1: i32, %arg2: memref<9xi32, #tpu.memory_space<smem>>, %arg3: memref<9xi32, #tpu.memory_space<smem>>) -> (i32, i32, i32, i32) {
    %c0_i32 = arith.constant 0 : i32
    %c0_i32_0 = arith.constant 0 : i32
    %c0_i32_1 = arith.constant 0 : i32
    return %arg1, %arg0, %c0_i32, %c0_i32_0 : i32, i32, i32, i32
  }
  func.func @transform_1(%arg0: i32, %arg1: i32, %arg2: memref<9xi32, #tpu.memory_space<smem>>, %arg3: memref<9xi32, #tpu.memory_space<smem>>) -> (i32, i32) {
    %c0_i32 = arith.constant 0 : i32
    %c0_i32_0 = arith.constant 0 : i32
    %c0_i32_1 = arith.constant 0 : i32
    return %c0_i32, %c0_i32_0 : i32, i32
  }
  func.func @transform_2(%arg0: i32, %arg1: i32, %arg2: memref<9xi32, #tpu.memory_space<smem>>, %arg3: memref<9xi32, #tpu.memory_space<smem>>) -> (i32, i32, i32) {
    %c0_i32 = arith.constant 0 : i32
    %c0_i32_0 = arith.constant 0 : i32
    %c0_i32_1 = arith.constant 0 : i32
    return %arg1, %c0_i32, %c0_i32_0 : i32, i32, i32
  }
  func.func @transform_3(%arg0: i32, %arg1: i32, %arg2: memref<9xi32, #tpu.memory_space<smem>>, %arg3: memref<9xi32, #tpu.memory_space<smem>>) -> (i32, i32, i32, i32) {
    %c0_i32 = arith.constant 0 : i32
    %c0_i32_0 = arith.constant 0 : i32
    %c0_i32_1 = arith.constant 0 : i32
    %c0_i32_2 = arith.constant 0 : i32
    return %arg0, %c0_i32, %c0_i32_0, %c0_i32_1 : i32, i32, i32, i32
  }
}

</mosaic_0001>

<bundles_post_ra>
// kernel: tpu_custom_call.1
= control target key start
LH: loop header
LB: loop body
LE: loop exit
PB: predicated region body
PF: predicated region fallthrough
CT: control target
= control target key end

     0   :  { %s2041_s0 = inlined_call_operand.vmem [shape: s32[9], index: 0, kind: input, shape index: {}]   ;;  %s2042_s2 = inlined_call_operand.vmem [shape: f32[9,2,16,128], index: 2, kind: input, shape index: {}]   ;;  %s2043_s3 = inlined_call_operand.vmem [shape: f32[128,128], index: 3, kind: input, shape index: {}]   ;;  %s2044_s4 = inlined_call_operand.vmem [shape: f32[9,256,16], index: 4, kind: input, shape index: {}]   ;;  %s2045_s5 = inlined_call_operand.hbm [shape: f32[2,32,32,128], index: 5, kind: output, shape index: {}]   ;;  %s2046_s1 = inlined_call_operand.vmem [shape: s32[9], index: 1, kind: input, shape index: {}]  }
   0x1   :  { %s10_s20 = sshll.u32 %s2041_s0, 4  ;;  %s14_s23 = sshll.u32 %s2046_s1, 4  ;;  %s11_s20 = int_to_ptr.vmem [resolvable:$true] %s10_s20  ;;  %s15_s23 = int_to_ptr.vmem [resolvable:$true] %s14_s23 }
   0x2   :  { %s1289_s24 = scalar_lea.vmem %s11_s20, 16  ;;  %p1294_p1 = scmp.lt.s32.totalorder %s11_s20, %s11_s20 }
   0x3   :  { %p1290_p0 = scmp.ne.s32.totalorder %s11_s20, %s1289_s24  ;;  %p1295_p2 = scmp.lt.s32.totalorder %s1289_s24, %s1289_s24 }
   0x5   :  { %p1296_p3 = por %p1295_p2, %p1294_p1 }
   0x7   :  { %p1297_p4 = pnand %p1296_p3, %p1290_p0 }
   0x9   :  { %1300 = shalt.err (!%p1297_p4)  }
   0xa   :  { %s1409_s25 = smov [#allocation3]   ;;  %s1301_s26 = scalar_lea.vmem %s15_s23, 16 }
   0xb   :  { %13 = dma.vmem_to_smem %s11_s20, 16, %s1409_s25, [#allocation2] }
   0xc   :  { %p1302_p5 = scmp.ne.s32.totalorder %s15_s23, %s1301_s26  ;;  %p1306_p6 = scmp.lt.s32.totalorder %s15_s23, %s15_s23 }
   0xd   :  { %p1307_p7 = scmp.lt.s32.totalorder %s1301_s26, %s1301_s26 }
   0xf   :  { %p1308_p8 = por %p1307_p7, %p1306_p6 }
  0x11   :  { %p1309_p9 = pnand %p1308_p8, %p1302_p5 }
  0x13   :  { %1312 = shalt.err (!%p1309_p9)  }
  0x14   :  { %s1410_s0 = smov [#allocation4]  }
  0x15   :  { %17 = dma.vmem_to_smem %s15_s23, 16, %s1410_s0, [#allocation2] }
  0x16   :  { %1371 = dma.done.wait [#allocation2], 32 }
  0x17   :  { %1372 = vsyncadd [#allocation2], 4294967264 }
  0x18   :  { %19 = sfence }
  0x19   :  { %20 = vsyncpa [#allocation6], 0 }
  0x1a   :  { %22 = vsyncpa [#allocation6 + $0x1], 0  ;;  %s1451_s1 = smov 0   ;;  %s1453_s27 = smov 0  }
  0x1b   :  { %s1455_s28 = smov 0   ;;  %s1457_s29 = smov 0  }
  0x1c   :  { %s1459_s30 = smov 0   ;;  %s1461_s6 = smov 0  }
  0x1d   :  { %s1463_s7 = smov 0   ;;  %s1465_s8 = smov 0  }
  0x1e LB: > { %s1018_s9 = sadd.s32 4294967295, %s1407_s8   ;;  %s1019_s10 = sadd.s32 4294967294, %s1407_s8   ;;  %s1407_s8 = sphi %s1465_s8, %s28_s8   ;;  %s1403_s7 = sphi %s1463_s7, %s2060_s7   ;;  %s1399_s6 = sphi %s1461_s6, %s2059_s6   ;;  %s1395_s30 = sphi %s1459_s30, %s2058_s30   ;;  %s1391_s29 = sphi %s1457_s29, %s2057_s29   ;;  %s1387_s28 = sphi %s1455_s28, %s2056_s28   ;;  %s1383_s27 = sphi %s1453_s27, %s2055_s27   ;;  %s1379_s1 = sphi %s1451_s1, %s2054_s1  }
  0x1f   : > { %s37_s11 = sadd.s32 1, %s1399_s6  ;;  %s40_s12 = sadd.s32 1, %s1403_s7 }
  0x20   : > { %p38_p10 = scmp.ge.s32.totalorder %s37_s11, 9  ;;  %p132_p11 = scmp.ne.s32.totalorder %s1387_s28, %s1383_s27 }
  0x21   : > { %p133_p12 = scmp.eq.s32.totalorder %s1018_s9, 17  ;;  %p138_p0 = scmp.ne.s32.totalorder %s1383_s27, %s1379_s1 }
  0x22   : > { %s2062_s11 = smov (%p38_p10, %s37_s11), 0  ;;  %s2064_s12 = smov (!%p38_p10, %s40_s12), %s1403_s7 }
  0x23   : > { %2048 = sst [smem:[#allocation9_spill]] %s2062_s11  ;;  %p1500_p13 = por %p133_p12, %p132_p11 }
  0x24   : > { %p42_p1 = scmp.ge.s32.totalorder %s2064_s12, 2  ;;  %p139_p2 = scmp.eq.s32.totalorder %s1019_s10, 17 }
  0x25   : > { %p1022_p3 = scmp.ge.s32.totalorder %s1407_s8, 1  ;;  %p180_p4 = scmp.lt.s32.totalorder %s1407_s8, 19 }
  0x26   : > { %s2066_s12 = smov (%p42_p1, %s2064_s12), 0  ;;  %p1510_p5 = por %p139_p2, %p138_p0 }
  0x27   : > { %2050 = sst [smem:[#allocation10_spill]] %s2066_s12  ;;  %p181_p6 = pnand %p1022_p3, %p180_p4 }
  0x28   : > { %s119_s15 = ssub.s32 %s1403_s7, %s2066_s12  ;;  %s122_s16 = sadd.s32 1, %s1387_s28 }
  0x29   : > { %p120_p7 = scmp.eq.s32.totalorder %s119_s15, 0  ;;  %184 = sbr.rel (%p181_p6) target bundleno = 605 (0x25d), region = 32 }
  0x2a   : > { %s210_s18 = sand.u32 (!%p181_p6), 1, %s1383_s27   ;;  %p213_p8 = scmp.lt.s32.totalorder (!%p181_p6), %s1391_s29, 8 }
  0x2b   : > { %s1518_s17 = scalar_select %p120_p7, %s1387_s28, %s122_s16  }
  0x2c   : > { %s1023_s19 = sshll.u32 (!%p181_p6), %s210_s18, 10  ;;  %p215_p9 = scmp.lt.s32.totalorder (!%p181_p6), %s1395_s30, 1 }
  0x2d   : > { %s1537_s11 = scalar_lea.vmem (!%p181_p6), [#allocation5], %s1023_s19  ;;  %p1029_p10 = scmp.ne.s32.totalorder (!%p181_p6), %s1391_s29, 0 }
  0x2e   : > { %s214_s20 = scalar_select %p213_p8, %s1391_s29, 8 }
  0x2f   : > { %s216_s21 = scalar_select %p215_p9, %s1395_s30, 1 }
  0x30   : > { %s1025_s22 = sshll.u32 %s214_s20, 2  ;;  %s1068_s23 = sshll.u32 %s214_s20, 8 }
  0x31   : > { %s1024_s24 = sshll.u32 %s216_s21, 1  ;;  %s1530_s0 = scalar_lea.vmem %s2044_s4, %s1068_s23 }
  0x32   : > { %s219_s9 = sadd.s32 %s1025_s22, %s1024_s24  ;;  %230 = sbr.rel (%p1029_p10) target bundleno = 120 (0x78), region = 36 }
  0x33   : > { %s1026_s10 = sshll.u32 %s219_s9, 3 }
  0x34   : > { %s1535_s12 = scalar_lea.vmem %s2042_s2, %s1026_s10 }
  0x37   : > { %v1411_v0 = vmov 0.0  }
  0x38   : > { %231 = vst [vmem:[%s1537_s11] sm:$0xff] %v1411_v0  ;;  %232 = vst [vmem:[%s1537_s11 + $0x8] sm:$0xff] %v1411_v0 }
  0x39   : > { %233 = vst [vmem:[%s1537_s11 + $0x10] sm:$0xff] %v1411_v0  ;;  %234 = vst [vmem:[%s1537_s11 + $0x18] sm:$0xff] %v1411_v0 }
  0x3a   : > { %235 = vst [vmem:[%s1537_s11 + $0x20] sm:$0xff] %v1411_v0  ;;  %236 = vst [vmem:[%s1537_s11 + $0x28] sm:$0xff] %v1411_v0 }
  0x3b   : > { %237 = vst [vmem:[%s1537_s11 + $0x30] sm:$0xff] %v1411_v0  ;;  %238 = vst [vmem:[%s1537_s11 + $0x38] sm:$0xff] %v1411_v0 }
  0x3c   : > { %239 = vst [vmem:[%s1537_s11 + $0x40] sm:$0xff] %v1411_v0  ;;  %240 = vst [vmem:[%s1537_s11 + $0x48] sm:$0xff] %v1411_v0 }
  0x3d   : > { %241 = vst [vmem:[%s1537_s11 + $0x50] sm:$0xff] %v1411_v0  ;;  %242 = vst [vmem:[%s1537_s11 + $0x58] sm:$0xff] %v1411_v0 }
  0x3e   : > { %243 = vst [vmem:[%s1537_s11 + $0x60] sm:$0xff] %v1411_v0  ;;  %244 = vst [vmem:[%s1537_s11 + $0x68] sm:$0xff] %v1411_v0 }
  0x3f   : > { %245 = vst [vmem:[%s1537_s11 + $0x70] sm:$0xff] %v1411_v0  ;;  %246 = vst [vmem:[%s1537_s11 + $0x78] sm:$0xff] %v1411_v0 }
  0x40   : > { %247 = vst [vmem:[%s1537_s11 + $0x80] sm:$0xff] %v1411_v0  ;;  %248 = vst [vmem:[%s1537_s11 + $0x88] sm:$0xff] %v1411_v0 }
  0x41   : > { %249 = vst [vmem:[%s1537_s11 + $0x90] sm:$0xff] %v1411_v0  ;;  %250 = vst [vmem:[%s1537_s11 + $0x98] sm:$0xff] %v1411_v0 }
  0x42   : > { %251 = vst [vmem:[%s1537_s11 + $0xa0] sm:$0xff] %v1411_v0  ;;  %252 = vst [vmem:[%s1537_s11 + $0xa8] sm:$0xff] %v1411_v0 }
  0x43   : > { %253 = vst [vmem:[%s1537_s11 + $0xb0] sm:$0xff] %v1411_v0  ;;  %254 = vst [vmem:[%s1537_s11 + $0xb8] sm:$0xff] %v1411_v0 }
  0x44   : > { %255 = vst [vmem:[%s1537_s11 + $0xc0] sm:$0xff] %v1411_v0  ;;  %256 = vst [vmem:[%s1537_s11 + $0xc8] sm:$0xff] %v1411_v0 }
  0x45   : > { %257 = vst [vmem:[%s1537_s11 + $0xd0] sm:$0xff] %v1411_v0  ;;  %258 = vst [vmem:[%s1537_s11 + $0xd8] sm:$0xff] %v1411_v0 }
  0x46   : > { %259 = vst [vmem:[%s1537_s11 + $0xe0] sm:$0xff] %v1411_v0  ;;  %260 = vst [vmem:[%s1537_s11 + $0xe8] sm:$0xff] %v1411_v0 }
  0x47   : > { %261 = vst [vmem:[%s1537_s11 + $0xf0] sm:$0xff] %v1411_v0  ;;  %262 = vst [vmem:[%s1537_s11 + $0xf8] sm:$0xff] %v1411_v0 }
  0x48   : > { %263 = vst [vmem:[%s1537_s11 + $0x100] sm:$0xff] %v1411_v0  ;;  %264 = vst [vmem:[%s1537_s11 + $0x108] sm:$0xff] %v1411_v0 }
  0x49   : > { %265 = vst [vmem:[%s1537_s11 + $0x110] sm:$0xff] %v1411_v0  ;;  %266 = vst [vmem:[%s1537_s11 + $0x118] sm:$0xff] %v1411_v0 }
  0x4a   : > { %267 = vst [vmem:[%s1537_s11 + $0x120] sm:$0xff] %v1411_v0  ;;  %268 = vst [vmem:[%s1537_s11 + $0x128] sm:$0xff] %v1411_v0 }
  0x4b   : > { %269 = vst [vmem:[%s1537_s11 + $0x130] sm:$0xff] %v1411_v0  ;;  %270 = vst [vmem:[%s1537_s11 + $0x138] sm:$0xff] %v1411_v0 }
  0x4c   : > { %271 = vst [vmem:[%s1537_s11 + $0x140] sm:$0xff] %v1411_v0  ;;  %272 = vst [vmem:[%s1537_s11 + $0x148] sm:$0xff] %v1411_v0 }
  0x4d   : > { %273 = vst [vmem:[%s1537_s11 + $0x150] sm:$0xff] %v1411_v0  ;;  %274 = vst [vmem:[%s1537_s11 + $0x158] sm:$0xff] %v1411_v0 }
  0x4e   : > { %275 = vst [vmem:[%s1537_s11 + $0x160] sm:$0xff] %v1411_v0  ;;  %276 = vst [vmem:[%s1537_s11 + $0x168] sm:$0xff] %v1411_v0 }
  0x4f   : > { %277 = vst [vmem:[%s1537_s11 + $0x170] sm:$0xff] %v1411_v0  ;;  %278 = vst [vmem:[%s1537_s11 + $0x178] sm:$0xff] %v1411_v0 }
  0x50   : > { %279 = vst [vmem:[%s1537_s11 + $0x180] sm:$0xff] %v1411_v0  ;;  %280 = vst [vmem:[%s1537_s11 + $0x188] sm:$0xff] %v1411_v0 }
  0x51   : > { %281 = vst [vmem:[%s1537_s11 + $0x190] sm:$0xff] %v1411_v0  ;;  %282 = vst [vmem:[%s1537_s11 + $0x198] sm:$0xff] %v1411_v0 }
  0x52   : > { %283 = vst [vmem:[%s1537_s11 + $0x1a0] sm:$0xff] %v1411_v0  ;;  %284 = vst [vmem:[%s1537_s11 + $0x1a8] sm:$0xff] %v1411_v0 }
  0x53   : > { %285 = vst [vmem:[%s1537_s11 + $0x1b0] sm:$0xff] %v1411_v0  ;;  %286 = vst [vmem:[%s1537_s11 + $0x1b8] sm:$0xff] %v1411_v0 }
  0x54   : > { %287 = vst [vmem:[%s1537_s11 + $0x1c0] sm:$0xff] %v1411_v0  ;;  %288 = vst [vmem:[%s1537_s11 + $0x1c8] sm:$0xff] %v1411_v0 }
  0x55   : > { %289 = vst [vmem:[%s1537_s11 + $0x1d0] sm:$0xff] %v1411_v0  ;;  %290 = vst [vmem:[%s1537_s11 + $0x1d8] sm:$0xff] %v1411_v0 }
  0x56   : > { %291 = vst [vmem:[%s1537_s11 + $0x1e0] sm:$0xff] %v1411_v0  ;;  %292 = vst [vmem:[%s1537_s11 + $0x1e8] sm:$0xff] %v1411_v0 }
  0x57   : > { %293 = vst [vmem:[%s1537_s11 + $0x1f0] sm:$0xff] %v1411_v0  ;;  %294 = vst [vmem:[%s1537_s11 + $0x1f8] sm:$0xff] %v1411_v0 }
  0x58   : > { %295 = vst [vmem:[%s1537_s11 + $0x200] sm:$0xff] %v1411_v0  ;;  %296 = vst [vmem:[%s1537_s11 + $0x208] sm:$0xff] %v1411_v0 }
  0x59   : > { %297 = vst [vmem:[%s1537_s11 + $0x210] sm:$0xff] %v1411_v0  ;;  %298 = vst [vmem:[%s1537_s11 + $0x218] sm:$0xff] %v1411_v0 }
  0x5a   : > { %299 = vst [vmem:[%s1537_s11 + $0x220] sm:$0xff] %v1411_v0  ;;  %300 = vst [vmem:[%s1537_s11 + $0x228] sm:$0xff] %v1411_v0 }
  0x5b   : > { %301 = vst [vmem:[%s1537_s11 + $0x230] sm:$0xff] %v1411_v0  ;;  %302 = vst [vmem:[%s1537_s11 + $0x238] sm:$0xff] %v1411_v0 }
  0x5c   : > { %303 = vst [vmem:[%s1537_s11 + $0x240] sm:$0xff] %v1411_v0  ;;  %304 = vst [vmem:[%s1537_s11 + $0x248] sm:$0xff] %v1411_v0 }
  0x5d   : > { %305 = vst [vmem:[%s1537_s11 + $0x250] sm:$0xff] %v1411_v0  ;;  %306 = vst [vmem:[%s1537_s11 + $0x258] sm:$0xff] %v1411_v0 }
  0x5e   : > { %307 = vst [vmem:[%s1537_s11 + $0x260] sm:$0xff] %v1411_v0  ;;  %308 = vst [vmem:[%s1537_s11 + $0x268] sm:$0xff] %v1411_v0 }
  0x5f   : > { %309 = vst [vmem:[%s1537_s11 + $0x270] sm:$0xff] %v1411_v0  ;;  %310 = vst [vmem:[%s1537_s11 + $0x278] sm:$0xff] %v1411_v0 }
  0x60   : > { %311 = vst [vmem:[%s1537_s11 + $0x280] sm:$0xff] %v1411_v0  ;;  %312 = vst [vmem:[%s1537_s11 + $0x288] sm:$0xff] %v1411_v0 }
  0x61   : > { %313 = vst [vmem:[%s1537_s11 + $0x290] sm:$0xff] %v1411_v0  ;;  %314 = vst [vmem:[%s1537_s11 + $0x298] sm:$0xff] %v1411_v0 }
  0x62   : > { %315 = vst [vmem:[%s1537_s11 + $0x2a0] sm:$0xff] %v1411_v0  ;;  %316 = vst [vmem:[%s1537_s11 + $0x2a8] sm:$0xff] %v1411_v0 }
  0x63   : > { %317 = vst [vmem:[%s1537_s11 + $0x2b0] sm:$0xff] %v1411_v0  ;;  %318 = vst [vmem:[%s1537_s11 + $0x2b8] sm:$0xff] %v1411_v0 }
  0x64   : > { %319 = vst [vmem:[%s1537_s11 + $0x2c0] sm:$0xff] %v1411_v0  ;;  %320 = vst [vmem:[%s1537_s11 + $0x2c8] sm:$0xff] %v1411_v0 }
  0x65   : > { %321 = vst [vmem:[%s1537_s11 + $0x2d0] sm:$0xff] %v1411_v0  ;;  %322 = vst [vmem:[%s1537_s11 + $0x2d8] sm:$0xff] %v1411_v0 }
  0x66   : > { %323 = vst [vmem:[%s1537_s11 + $0x2e0] sm:$0xff] %v1411_v0  ;;  %324 = vst [vmem:[%s1537_s11 + $0x2e8] sm:$0xff] %v1411_v0 }
  0x67   : > { %325 = vst [vmem:[%s1537_s11 + $0x2f0] sm:$0xff] %v1411_v0  ;;  %326 = vst [vmem:[%s1537_s11 + $0x2f8] sm:$0xff] %v1411_v0 }
  0x68   : > { %327 = vst [vmem:[%s1537_s11 + $0x300] sm:$0xff] %v1411_v0  ;;  %328 = vst [vmem:[%s1537_s11 + $0x308] sm:$0xff] %v1411_v0 }
  0x69   : > { %329 = vst [vmem:[%s1537_s11 + $0x310] sm:$0xff] %v1411_v0  ;;  %330 = vst [vmem:[%s1537_s11 + $0x318] sm:$0xff] %v1411_v0 }
  0x6a   : > { %331 = vst [vmem:[%s1537_s11 + $0x320] sm:$0xff] %v1411_v0  ;;  %332 = vst [vmem:[%s1537_s11 + $0x328] sm:$0xff] %v1411_v0 }
  0x6b   : > { %333 = vst [vmem:[%s1537_s11 + $0x330] sm:$0xff] %v1411_v0  ;;  %334 = vst [vmem:[%s1537_s11 + $0x338] sm:$0xff] %v1411_v0 }
  0x6c   : > { %335 = vst [vmem:[%s1537_s11 + $0x340] sm:$0xff] %v1411_v0  ;;  %336 = vst [vmem:[%s1537_s11 + $0x348] sm:$0xff] %v1411_v0 }
  0x6d   : > { %337 = vst [vmem:[%s1537_s11 + $0x350] sm:$0xff] %v1411_v0  ;;  %338 = vst [vmem:[%s1537_s11 + $0x358] sm:$0xff] %v1411_v0 }
  0x6e   : > { %339 = vst [vmem:[%s1537_s11 + $0x360] sm:$0xff] %v1411_v0  ;;  %340 = vst [vmem:[%s1537_s11 + $0x368] sm:$0xff] %v1411_v0 }
  0x6f   : > { %341 = vst [vmem:[%s1537_s11 + $0x370] sm:$0xff] %v1411_v0  ;;  %342 = vst [vmem:[%s1537_s11 + $0x378] sm:$0xff] %v1411_v0 }
  0x70   : > { %343 = vst [vmem:[%s1537_s11 + $0x380] sm:$0xff] %v1411_v0  ;;  %344 = vst [vmem:[%s1537_s11 + $0x388] sm:$0xff] %v1411_v0 }
  0x71   : > { %345 = vst [vmem:[%s1537_s11 + $0x390] sm:$0xff] %v1411_v0  ;;  %346 = vst [vmem:[%s1537_s11 + $0x398] sm:$0xff] %v1411_v0 }
  0x72   : > { %347 = vst [vmem:[%s1537_s11 + $0x3a0] sm:$0xff] %v1411_v0  ;;  %348 = vst [vmem:[%s1537_s11 + $0x3a8] sm:$0xff] %v1411_v0 }
  0x73   : > { %349 = vst [vmem:[%s1537_s11 + $0x3b0] sm:$0xff] %v1411_v0  ;;  %350 = vst [vmem:[%s1537_s11 + $0x3b8] sm:$0xff] %v1411_v0 }
  0x74   : > { %351 = vst [vmem:[%s1537_s11 + $0x3c0] sm:$0xff] %v1411_v0  ;;  %352 = vst [vmem:[%s1537_s11 + $0x3c8] sm:$0xff] %v1411_v0 }
  0x75   : > { %353 = vst [vmem:[%s1537_s11 + $0x3d0] sm:$0xff] %v1411_v0  ;;  %354 = vst [vmem:[%s1537_s11 + $0x3d8] sm:$0xff] %v1411_v0 }
  0x76   : > { %355 = vst [vmem:[%s1537_s11 + $0x3e0] sm:$0xff] %v1411_v0  ;;  %356 = vst [vmem:[%s1537_s11 + $0x3e8] sm:$0xff] %v1411_v0 }
  0x77   : > { %357 = vst [vmem:[%s1537_s11 + $0x3f0] sm:$0xff] %v1411_v0  ;;  %358 = vst [vmem:[%s1537_s11 + $0x3f8] sm:$0xff] %v1411_v0 }
  0x78 PF: > { %v376_v1 = vld [vmem:[%s2043_s3 + $0x78] sm:$0xff]  ;;  %v375_v2 = vld [vmem:[%s2043_s3 + $0x70] sm:$0xff]  ;;  %v374_v3 = vld [vmem:[%s2043_s3 + $0x68] sm:$0xff]  ;;  %vm484_vm0 = vcmask 130048   ;;  %s807_s9 = sld [smem:[#allocation4 + %s1391_s29]]  ;;  %s1412_s22 = smov [#allocation5]  }
  0x79   : > { %1122 = vmatprep.subr.mxu0 %v376_v1  ;;  %v373_v4 = vld [vmem:[%s2043_s3 + $0x60] sm:$0xff]  ;;  %v372_v6 = vld [vmem:[%s2043_s3 + $0x58] sm:$0xff]  ;;  %v371_v7 = vld [vmem:[%s2043_s3 + $0x50] sm:$0xff]  ;;  %s1317_s23 = sshll.u32 %s1412_s22, 4  ;;  %s1318_s23 = int_to_ptr.vmem [resolvable:$false] %s1317_s23 }
  0x7a   : > { %1123 = vmatpush3.msra.mxu0 %v376_v1  ;;  %v359_v5 = vld [vmem:[%s1535_s12] sm:$0xff]  ;;  %v370_v8 = vld [vmem:[%s2043_s3 + $0x48] sm:$0xff]  ;;  %v368_v10 = vld [vmem:[%s2043_s3 + $0x38] sm:$0xff]  ;;  %s1319_s24 = scalar_lea.vmem %s1318_s23, 32768 }
  0x7b   : > { %1124 = vmatprep.subr.mxu0 %v375_v2  ;;  %1154 = vmatprep.mubr.f32.mxu0 %v359_v5  ;;  %v369_v9 = vld [vmem:[%s2043_s3 + $0x40] sm:$0xff]  ;;  %v367_v11 = vld [vmem:[%s2043_s3 + $0x30] sm:$0xff]  ;;  %v366_v12 = vld [vmem:[%s2043_s3 + $0x28] sm:$0xff] }
  0x7c   : > { %1125 = vmatpush3.msra.mxu0 %v375_v2  ;;  %v365_v13 = vld [vmem:[%s2043_s3 + $0x20] sm:$0xff]  ;;  %v364_v14 = vld [vmem:[%s2043_s3 + $0x18] sm:$0xff]  ;;  %v363_v15 = vld [vmem:[%s2043_s3 + $0x10] sm:$0xff] }
  0x7d   : > { %1126 = vmatprep.subr.mxu0 %v374_v3  ;;  %v362_v16 = vld [vmem:[%s2043_s3 + $0x8] sm:$0xff]  ;;  %v361_v17 = vld [vmem:[%s2043_s3] sm:$0xff]  ;;  %v462_v25 = vld [vmem:[%s1530_s0 + $0x50] sm:$0xff] }
  0x7e   : > { %1127 = vmatpush3.msra.mxu0 %v374_v3  ;;  %v360_v18 = vld [vmem:[%s1535_s12 + $0x8] sm:$0xff]  ;;  %v460_v19 = vld [vmem:[%s1530_s0 + $0x40] sm:$0xff]  ;;  %v454_v26 = vld [vmem:[%s1530_s0 + $0x10] sm:$0xff]  ;;  %s806_s12 = sld [smem:[#allocation3 + %s1391_s29]]  ;;  %s1069_s29 = sshll.u32 %s1395_s30, 14 }
  0x7f   : > { %1128 = vmatprep.subr.mxu0 %v373_v4  ;;  %1173 = vmatprep.mubr.msk.f32.mxu1 %vm484_vm0, %v460_v19  ;;  %v452_v20 = vld [vmem:[%s1530_s0] sm:$0xff]  ;;  %v461_v23 = vld [vmem:[%s1530_s0 + $0x48] sm:$0xff]  ;;  %v463_v27 = vld [vmem:[%s1530_s0 + $0x58] sm:$0xff]  ;;  %s1982_s21 = scalar_lea.hbm %s2045_s5, %s1069_s29  ;;  %s1990_s30 = scalar_lea.sflag [#allocation6], %s210_s18 }
  0x80   : > { %1129 = vmatpush3.msra.mxu0 %v373_v4  ;;  %v453_v24 = vld [vmem:[%s1530_s0 + $0x8] sm:$0xff]  ;;  %v455_v28 = vld [vmem:[%s1530_s0 + $0x18] sm:$0xff]  ;;  %v464_v29 = vld [vmem:[%s1530_s0 + $0x60] sm:$0xff] }
  0x81   : > { %1130 = vmatprep.subr.mxu0 %v372_v6  ;;  %v456_v30 = vld [vmem:[%s1530_s0 + $0x20] sm:$0xff]  ;;  %v465_v31 = vld [vmem:[%s1530_s0 + $0x68] sm:$0xff]  ;;  %v466_v33 = vld [vmem:[%s1530_s0 + $0x70] sm:$0xff] }
  0x82   : > { %1131 = vmatpush3.msra.mxu0 %v372_v6  ;;  %v457_v32 = vld [vmem:[%s1530_s0 + $0x28] sm:$0xff]  ;;  %v458_v34 = vld [vmem:[%s1530_s0 + $0x30] sm:$0xff]  ;;  %v467_v35 = vld [vmem:[%s1530_s0 + $0x78] sm:$0xff] }
  0x83   : > { %1132 = vmatprep.subr.mxu0 %v371_v7  ;;  %v459_v36 = vld [vmem:[%s1530_s0 + $0x38] sm:$0xff]  ;;  %v468_v37 = vld [vmem:[%s1530_s0 + $0x80] sm:$0xff]  ;;  %v469_v38 = vld [vmem:[%s1530_s0 + $0x88] sm:$0xff] }
  0x84   : > { %1133 = vmatpush3.msra.mxu0 %v371_v7  ;;  %v470_v39 = vld [vmem:[%s1530_s0 + $0x90] sm:$0xff]  ;;  %v471_v40 = vld [vmem:[%s1530_s0 + $0x98] sm:$0xff]  ;;  %v472_v41 = vld [vmem:[%s1530_s0 + $0xa0] sm:$0xff]  ;;  %s1062_s10 = sshll.u32 %s806_s12, 5 }
  0x85   : > { %1134 = vmatprep.subr.mxu0 %v370_v8  ;;  %v473_v42 = vld [vmem:[%s1530_s0 + $0xa8] sm:$0xff]  ;;  %v474_v43 = vld [vmem:[%s1530_s0 + $0xb0] sm:$0xff]  ;;  %v475_v44 = vld [vmem:[%s1530_s0 + $0xb8] sm:$0xff]  ;;  %s809_s15 = sadd.s32 %s1062_s10, %s807_s9 }
  0x86   : > { %1135 = vmatpush3.msra.mxu0 %v370_v8  ;;  %v476_v45 = vld [vmem:[%s1530_s0 + $0xc0] sm:$0xff]  ;;  %v477_v46 = vld [vmem:[%s1530_s0 + $0xc8] sm:$0xff]  ;;  %v478_v47 = vld [vmem:[%s1530_s0 + $0xd0] sm:$0xff]  ;;  %s1913_s16 = scalar_lea.vmem %s1537_s11, %s809_s15 [#allocation5] }
  0x87   : > { %1136 = vmatprep.subr.mxu0 %v369_v9  ;;  %v479_v48 = vld [vmem:[%s1530_s0 + $0xd8] sm:$0xff]  ;;  %v480_v49 = vld [vmem:[%s1530_s0 + $0xe0] sm:$0xff]  ;;  %v481_v50 = vld [vmem:[%s1530_s0 + $0xe8] sm:$0xff] }
  0x88   : > { %1137 = vmatpush3.msra.mxu0 %v369_v9  ;;  %v482_v51 = vld [vmem:[%s1530_s0 + $0xf0] sm:$0xff]  ;;  %v483_v52 = vld [vmem:[%s1530_s0 + $0xf8] sm:$0xff]  ;;  %v820_v53 = vld [vmem:[%s1913_s16 + $0x88] sm:$0xff]  ;;  %s921_s0 = sshll.u32 %s1537_s11, 4  ;;  %s1984_s0 = int_to_ptr.vmem [resolvable:$true] %s921_s0 }
  0x89   : > { %1138 = vmatprep.subr.mxu0 %v368_v10  ;;  %v812_v54 = vld [vmem:[%s1913_s16 + $0x8] sm:$0xff]  ;;  %v819_v56 = vld [vmem:[%s1913_s16 + $0x80] sm:$0xff]  ;;  %s1313_s11 = scalar_lea.vmem %s1984_s0, 16384  ;;  %p1320_p1 = scmp.lt.s32.totalorder %s1984_s0, %s1318_s23 }
  0x8a   : > { %1139 = vmatpush3.msra.mxu0 %v368_v10  ;;  %v811_v58 = vld [vmem:[%s1913_s16] sm:$0xff]  ;;  %v822_v62 = vld [vmem:[%s1913_s16 + $0xa8] sm:$0xff]  ;;  %p1314_p11 = scmp.ne.s32.totalorder %s1984_s0, %s1313_s11  ;;  %p1321_p2 = scmp.lt.s32.totalorder %s1319_s24, %s1313_s11 }
  0x8b   : > { %1140 = vmatprep.subr.mxu0 %v367_v11  ;;  %v814_v0 = vld [vmem:[%s1913_s16 + $0x28] sm:$0xff]  ;;  %v821_v4 = vld [vmem:[%s1913_s16 + $0xa0] sm:$0xff] }
  0x8c   : > { %1141 = vmatpush3.msra.mxu0 %v367_v11  ;;  %v813_v6 = vld [vmem:[%s1913_s16 + $0x20] sm:$0xff]  ;;  %v824_v10 = vld [vmem:[%s1913_s16 + $0xc8] sm:$0xff]  ;;  %p1315_p12 = pnand %p1314_p11, %p1500_p13  ;;  %p1322_p3 = por %p1321_p2, %p1320_p1 }
  0x8d   : > { %1142 = vmatprep.subr.mxu0 %v366_v12 }
  0x8e   : > { %1143 = vmatpush3.msra.mxu0 %v366_v12  ;;  %v816_v12 = vld [vmem:[%s1913_s16 + $0x48] sm:$0xff]  ;;  %p1316_p0 = pneg %p1315_p12 }
  0x8f   : > { %1144 = vmatprep.subr.mxu0 %v365_v13 }
  0x90   : > { %1145 = vmatpush3.msra.mxu0 %v365_v13  ;;  %p1323_p4 = pnand %p1322_p3, %p1316_p0 }
  0x91   : > { %1146 = vmatprep.subr.mxu0 %v364_v14 }
  0x92   : > { %1147 = vmatpush3.msra.mxu0 %v364_v14 }
  0x93   : > { %1148 = vmatprep.subr.mxu0 %v363_v15 }
  0x94   : > { %1149 = vmatpush3.msra.mxu0 %v363_v15 }
  0x95   : > { %1150 = vmatprep.subr.mxu0 %v362_v16 }
  0x96   : > { %1151 = vmatpush3.msra.mxu0 %v362_v16  ;;  %v823_v16 = vld [vmem:[%s1913_s16 + $0xc0] sm:$0xff] }
  0x97   : > { %1152 = vmatprep.subr.mxu0 %v361_v17 }
  0x98   : > { %1153 = vmatpush3.msra.mxu0 %v361_v17 }
  0x99   : > { %1155 = vmatmul.mubr.f32.vlgmr.msra.gmra.mxu0 %v360_v18  ;;  %v815_v18 = vld [vmem:[%s1913_s16 + $0x40] sm:$0xff] }
  0x9a   : > { %1161 = vmatprep.mubr.msk.f32.mxu0 %vm484_vm0, %v452_v20 }
 0x159   : > { %v1156_v21 = vpop.f32.mrf.mxu0 }
 0x15a   : > { %1157 = vmatprep.subr.mxu0 %v1156_v21  ;;  %1209 = vmatprep.subr.mxu1 %v1156_v21 }
 0x15b   : > { %v443_v22 = vpop.f32.mrf.mxu0  ;;  %1158 = vmatpush3.msra.mxu0 %v1156_v21  ;;  %1211 = vmatpush3.msra.mxu1 %v1156_v21 }
 0x15c   : > { %1159 = vmatprep.subr.mxu0 %v443_v22  ;;  %1210 = vmatprep.subr.mxu1 %v443_v22 }
 0x15d   : > { %1160 = vmatpush3.msra.mxu0 %v443_v22  ;;  %1212 = vmatpush3.msra.mxu1 %v443_v22  ;;  %v826_v22 = vld [vmem:[%s1913_s16 + $0xe8] sm:$0xff] }
 0x15e   : > { %1174 = vmatmul.mubr.msk.f32.vlgmr.msra.gmra.mxu1 %vm484_vm0, %v461_v23  ;;  %1162 = vmatmul.mubr.msk.f32.vlgmr.msra.gmra.mxu0 %vm484_vm0, %v453_v24  ;;  %v818_v24 = vld [vmem:[%s1913_s16 + $0x68] sm:$0xff] }
 0x15f   : > { %1176 = vmatprep.mubr.msk.f32.mxu1 %vm484_vm0, %v462_v25  ;;  %1164 = vmatprep.mubr.msk.f32.mxu0 %vm484_vm0, %v454_v26 }
 0x162   : > { %1177 = vmatmul.mubr.msk.f32.gmra.mxu1 %vm484_vm0, %v463_v27  ;;  %1165 = vmatmul.mubr.msk.f32.gmra.mxu0 %vm484_vm0, %v455_v28  ;;  %v825_v28 = vld [vmem:[%s1913_s16 + $0xe0] sm:$0xff] }
 0x163   : > { %1179 = vmatprep.mubr.msk.f32.mxu1 %vm484_vm0, %v464_v29  ;;  %1167 = vmatprep.mubr.msk.f32.mxu0 %vm484_vm0, %v456_v30  ;;  %v817_v30 = vld [vmem:[%s1913_s16 + $0x60] sm:$0xff] }
 0x166   : > { %1180 = vmatmul.mubr.msk.f32.gmra.mxu1 %vm484_vm0, %v465_v31  ;;  %1168 = vmatmul.mubr.msk.f32.gmra.mxu0 %vm484_vm0, %v457_v32 }
 0x167   : > { %1182 = vmatprep.mubr.msk.f32.mxu1 %vm484_vm0, %v466_v33  ;;  %1170 = vmatprep.mubr.msk.f32.mxu0 %vm484_vm0, %v458_v34  ;;  %v828_v34 = vld [vmem:[%s1913_s16 + $0x108] sm:$0xff] }
 0x16a   : > { %1183 = vmatmul.mubr.msk.f32.gmra.mxu1 %vm484_vm0, %v467_v35  ;;  %1171 = vmatmul.mubr.msk.f32.gmra.mxu0 %vm484_vm0, %v459_v36 }
 0x16b   : > { %1185 = vmatprep.mubr.msk.f32.mxu1 %vm484_vm0, %v468_v37 }
 0x16e   : > { %1186 = vmatmul.mubr.msk.f32.gmra.mxu1 %vm484_vm0, %v469_v38 }
 0x16f   : > { %1188 = vmatprep.mubr.msk.f32.mxu1 %vm484_vm0, %v470_v39  ;;  %v827_v39 = vld [vmem:[%s1913_s16 + $0x100] sm:$0xff] }
 0x172   : > { %1189 = vmatmul.mubr.msk.f32.gmra.mxu1 %vm484_vm0, %v471_v40 }
 0x173   : > { %1191 = vmatprep.mubr.msk.f32.mxu1 %vm484_vm0, %v472_v41 }
 0x176   : > { %1192 = vmatmul.mubr.msk.f32.gmra.mxu1 %vm484_vm0, %v473_v42  ;;  %v830_v42 = vld [vmem:[%s1913_s16 + $0x128] sm:$0xff] }
 0x177   : > { %1194 = vmatprep.mubr.msk.f32.mxu1 %vm484_vm0, %v474_v43 }
 0x17a   : > { %1195 = vmatmul.mubr.msk.f32.gmra.mxu1 %vm484_vm0, %v475_v44 }
 0x17b   : > { %1197 = vmatprep.mubr.msk.f32.mxu1 %vm484_vm0, %v476_v45  ;;  %v829_v45 = vld [vmem:[%s1913_s16 + $0x120] sm:$0xff] }
 0x17e   : > { %1198 = vmatmul.mubr.msk.f32.gmra.mxu1 %vm484_vm0, %v477_v46 }
 0x17f   : > { %1200 = vmatprep.mubr.msk.f32.mxu1 %vm484_vm0, %v478_v47 }
 0x182   : > { %1201 = vmatmul.mubr.msk.f32.gmra.mxu1 %vm484_vm0, %v479_v48  ;;  %v832_v48 = vld [vmem:[%s1913_s16 + $0x148] sm:$0xff] }
 0x183   : > { %1203 = vmatprep.mubr.msk.f32.mxu1 %vm484_vm0, %v480_v49 }
 0x186   : > { %1204 = vmatmul.mubr.msk.f32.gmra.mxu1 %vm484_vm0, %v481_v50 }
 0x187   : > { %1206 = vmatprep.mubr.msk.f32.mxu1 %vm484_vm0, %v482_v51  ;;  %v831_v51 = vld [vmem:[%s1913_s16 + $0x140] sm:$0xff] }
 0x18a   : > { %1207 = vmatmul.mubr.msk.f32.gmra.mxu1 %vm484_vm0, %v483_v52 }
 0x21e   : > { %v1175_v55 = vpop.f32.mrf.mxu1  ;;  %v1163_v57 = vpop.f32.mrf.mxu0 }
 0x21f   : > { %v852_v59 = vadd.f32 %v1175_v55, %v820_v53  ;;  %v844_v60 = vadd.f32 %v1163_v57, %v812_v54  ;;  %v834_v54 = vld [vmem:[%s1913_s16 + $0x168] sm:$0xff]  ;;  %v833_v57 = vld [vmem:[%s1913_s16 + $0x160] sm:$0xff] }
 0x220   : > { %v687_v61 = vpop.f32.mrf.mxu1  ;;  %v647_v63 = vpop.f32.mrf.mxu0 }
 0x221   : > { %884 = vst [vmem:[%s1913_s16 + $0x88] sm:$0xff] %v852_v59  ;;  %v851_v1 = vadd.f32 %v819_v56, %v687_v61  ;;  %876 = vst [vmem:[%s1913_s16 + $0x8] sm:$0xff] %v844_v60  ;;  %v843_v2 = vadd.f32 %v811_v58, %v647_v63  ;;  %v836_v60 = vld [vmem:[%s1913_s16 + $0x188] sm:$0xff]  ;;  %v835_v63 = vld [vmem:[%s1913_s16 + $0x180] sm:$0xff] }
 0x222   : > { %v1178_v3 = vpop.f32.mrf.mxu1  ;;  %v1166_v5 = vpop.f32.mrf.mxu0 }
 0x223   : > { %883 = vst [vmem:[%s1913_s16 + $0x80] sm:$0xff] %v851_v1  ;;  %v854_v7 = vadd.f32 %v1178_v3, %v822_v62  ;;  %875 = vst [vmem:[%s1913_s16] sm:$0xff] %v843_v2  ;;  %v846_v8 = vadd.f32 %v1166_v5, %v814_v0  ;;  %v838_v2 = vld [vmem:[%s1913_s16 + $0x1a8] sm:$0xff]  ;;  %v837_v5 = vld [vmem:[%s1913_s16 + $0x1a0] sm:$0xff] }
 0x224   : > { %v697_v9 = vpop.f32.mrf.mxu1  ;;  %v657_v11 = vpop.f32.mrf.mxu0 }
 0x225   : > { %886 = vst [vmem:[%s1913_s16 + $0xa8] sm:$0xff] %v854_v7  ;;  %v853_v13 = vadd.f32 %v821_v4, %v697_v9  ;;  %878 = vst [vmem:[%s1913_s16 + $0x28] sm:$0xff] %v846_v8  ;;  %v845_v14 = vadd.f32 %v813_v6, %v657_v11  ;;  %v840_v8 = vld [vmem:[%s1913_s16 + $0x1c8] sm:$0xff]  ;;  %v839_v11 = vld [vmem:[%s1913_s16 + $0x1c0] sm:$0xff] }
 0x226   : > { %v1181_v15 = vpop.f32.mrf.mxu1  ;;  %v1169_v17 = vpop.f32.mrf.mxu0 }
 0x227   : > { %885 = vst [vmem:[%s1913_s16 + $0xa0] sm:$0xff] %v853_v13  ;;  %v856_v19 = vadd.f32 %v1181_v15, %v824_v10  ;;  %877 = vst [vmem:[%s1913_s16 + $0x20] sm:$0xff] %v845_v14  ;;  %v848_v20 = vadd.f32 %v1169_v17, %v816_v12  ;;  %v842_v14 = vld [vmem:[%s1913_s16 + $0x1e8] sm:$0xff]  ;;  %v841_v17 = vld [vmem:[%s1913_s16 + $0x1e0] sm:$0xff] }
 0x228   : > { %v707_v21 = vpop.f32.mrf.mxu1  ;;  %v667_v23 = vpop.f32.mrf.mxu0 }
 0x229   : > { %888 = vst [vmem:[%s1913_s16 + $0xc8] sm:$0xff] %v856_v19  ;;  %v855_v25 = vadd.f32 %v823_v16, %v707_v21  ;;  %880 = vst [vmem:[%s1913_s16 + $0x48] sm:$0xff] %v848_v20  ;;  %v847_v26 = vadd.f32 %v815_v18, %v667_v23 }
 0x22a   : > { %v1184_v27 = vpop.f32.mrf.mxu1  ;;  %v1172_v29 = vpop.f32.mrf.mxu0 }
 0x22b   : > { %887 = vst [vmem:[%s1913_s16 + $0xc0] sm:$0xff] %v855_v25  ;;  %v858_v31 = vadd.f32 %v1184_v27, %v826_v22  ;;  %879 = vst [vmem:[%s1913_s16 + $0x40] sm:$0xff] %v847_v26  ;;  %v850_v32 = vadd.f32 %v1172_v29, %v818_v24 }
 0x22c   : > { %v717_v33 = vpop.f32.mrf.mxu1  ;;  %v677_v35 = vpop.f32.mrf.mxu0 }
 0x22d   : > { %890 = vst [vmem:[%s1913_s16 + $0xe8] sm:$0xff] %v858_v31  ;;  %v857_v36 = vadd.f32 %v825_v28, %v717_v33  ;;  %882 = vst [vmem:[%s1913_s16 + $0x68] sm:$0xff] %v850_v32  ;;  %v849_v37 = vadd.f32 %v817_v30, %v677_v35 }
 0x22e   : > { %v1187_v38 = vpop.f32.mrf.mxu1 }
 0x22f   : > { %889 = vst [vmem:[%s1913_s16 + $0xe0] sm:$0xff] %v857_v36  ;;  %v860_v40 = vadd.f32 %v1187_v38, %v828_v34  ;;  %881 = vst [vmem:[%s1913_s16 + $0x60] sm:$0xff] %v849_v37 }
 0x230   : > { %v727_v41 = vpop.f32.mrf.mxu1 }
 0x231   : > { %892 = vst [vmem:[%s1913_s16 + $0x108] sm:$0xff] %v860_v40  ;;  %v859_v43 = vadd.f32 %v827_v39, %v727_v41 }
 0x232   : > { %v1190_v44 = vpop.f32.mrf.mxu1 }
 0x233   : > { %891 = vst [vmem:[%s1913_s16 + $0x100] sm:$0xff] %v859_v43  ;;  %v862_v46 = vadd.f32 %v1190_v44, %v830_v42 }
 0x234   : > { %v737_v47 = vpop.f32.mrf.mxu1 }
 0x235   : > { %894 = vst [vmem:[%s1913_s16 + $0x128] sm:$0xff] %v862_v46  ;;  %v861_v49 = vadd.f32 %v829_v45, %v737_v47 }
 0x236   : > { %v1193_v50 = vpop.f32.mrf.mxu1 }
 0x237   : > { %893 = vst [vmem:[%s1913_s16 + $0x120] sm:$0xff] %v861_v49  ;;  %v864_v52 = vadd.f32 %v1193_v50, %v832_v48 }
 0x238   : > { %v747_v53 = vpop.f32.mrf.mxu1 }
 0x239   : > { %896 = vst [vmem:[%s1913_s16 + $0x148] sm:$0xff] %v864_v52  ;;  %v863_v55 = vadd.f32 %v831_v51, %v747_v53 }
 0x23a   : > { %v1196_v56 = vpop.f32.mrf.mxu1 }
 0x23b   : > { %895 = vst [vmem:[%s1913_s16 + $0x140] sm:$0xff] %v863_v55  ;;  %v866_v58 = vadd.f32 %v1196_v56, %v834_v54 }
 0x23c   : > { %v757_v59 = vpop.f32.mrf.mxu1 }
 0x23d   : > { %898 = vst [vmem:[%s1913_s16 + $0x168] sm:$0xff] %v866_v58  ;;  %v865_v61 = vadd.f32 %v833_v57, %v757_v59 }
 0x23e   : > { %v1199_v62 = vpop.f32.mrf.mxu1 }
 0x23f   : > { %897 = vst [vmem:[%s1913_s16 + $0x160] sm:$0xff] %v865_v61  ;;  %v868_v0 = vadd.f32 %v1199_v62, %v836_v60 }
 0x240   : > { %v767_v1 = vpop.f32.mrf.mxu1 }
 0x241   : > { %900 = vst [vmem:[%s1913_s16 + $0x188] sm:$0xff] %v868_v0  ;;  %v867_v3 = vadd.f32 %v835_v63, %v767_v1 }
 0x242   : > { %v1202_v4 = vpop.f32.mrf.mxu1 }
 0x243   : > { %899 = vst [vmem:[%s1913_s16 + $0x180] sm:$0xff] %v867_v3  ;;  %v870_v6 = vadd.f32 %v1202_v4, %v838_v2 }
 0x244   : > { %v777_v7 = vpop.f32.mrf.mxu1 }
 0x245   : > { %902 = vst [vmem:[%s1913_s16 + $0x1a8] sm:$0xff] %v870_v6  ;;  %v869_v9 = vadd.f32 %v837_v5, %v777_v7 }
 0x246   : > { %v1205_v10 = vpop.f32.mrf.mxu1 }
 0x247   : > { %901 = vst [vmem:[%s1913_s16 + $0x1a0] sm:$0xff] %v869_v9  ;;  %v872_v12 = vadd.f32 %v1205_v10, %v840_v8 }
 0x248   : > { %v787_v13 = vpop.f32.mrf.mxu1 }
 0x249   : > { %904 = vst [vmem:[%s1913_s16 + $0x1c8] sm:$0xff] %v872_v12  ;;  %v871_v15 = vadd.f32 %v839_v11, %v787_v13 }
 0x24a   : > { %v1208_v16 = vpop.f32.mrf.mxu1 }
 0x24b   : > { %903 = vst [vmem:[%s1913_s16 + $0x1c0] sm:$0xff] %v871_v15  ;;  %v874_v18 = vadd.f32 %v1208_v16, %v842_v14 }
 0x24c   : > { %v797_v19 = vpop.f32.mrf.mxu1 }
 0x24d   : > { %906 = vst [vmem:[%s1913_s16 + $0x1e8] sm:$0xff] %v874_v18  ;;  %v873_v20 = vadd.f32 %v841_v17, %v797_v19 }
 0x24f   : > { %905 = vst [vmem:[%s1913_s16 + $0x1e0] sm:$0xff] %v873_v20 }
 0x250   : > { %1326 = shalt.err (!%p1323_p4)
}
 0x251   : > { %s1327_s18 = scalar_lea.hbm %s1982_s21, 16384  ;;  %s1331_s12 = scalar_lea.hbm %s2045_s5, 32768 }
 0x252   : > { %p1328_p6 = scmp.ne.s32.totalorder %s1982_s21, %s1327_s18  ;;  %p1332_p9 = scmp.lt.s32.totalorder %s1982_s21, %s2045_s5 }
 0x253   : > { %p1333_p10 = scmp.lt.s32.totalorder %s1331_s12, %s1327_s18 }
 0x254   : > { %p1329_p7 = pnand %p1328_p6, %p1500_p13 }
 0x255   : > { %p1334_p11 = por %p1333_p10, %p1332_p9 }
 0x256   : > { %p1330_p8 = pneg %p1329_p7 }
 0x258   : > { %p1335_p12 = pnand %p1334_p11, %p1330_p8 }
 0x25a   : > { %1338 = shalt.err (!%p1335_p12)
}
 0x25b   : > { %s1413_s15 = smov 128   ;;  %s1414_s16 = smov 8  }
 0x25c   : > { %1213 = dma.vmem_to_hbm [thread:$0]  (%p1500_p13), %s1984_s0, 16384, %s1982_s21, %s1990_s30, %s1413_s15, %s1413_s15, %s1414_s16  }
 0x25d PF: > { %p1219_p0 = scmp.ge.s32.totalorder %s1407_s8, 2  ;;  %s936_s29 = sand.u32 1, %s1379_s1  }
 0x25e   : > { %s937_s19 = scalar_lea.sflag [#allocation6], %s936_s29 }
 0x25f   : > { %p1216_p1 = pnand %p1219_p0, %p1510_p5 }
 0x261   : > { %p1217_p2 = pneg %p1216_p1 }
 0x263   : > { %1374 = dma.done.wait (%p1217_p2), %s937_s19, 16384  }
 0x264   : > { %1376 = vsyncadd (%p1217_p2), %s937_s19, 4294950912  ;;  %s28_s8 = sadd.s32 1, %s1407_s8   ;;  %s2052_s13 = sld [smem:[#allocation9_spill]] }
 0x265   : > { %p25_p3 = scmp.ge.s32.totalorder %s28_s8, 20   ;;  %s2053_s0 = sld [smem:[#allocation10_spill]] }
 0x266   : > { %s2054_s1 = smov %s1383_s27  ;;  %s2055_s27 = smov %s1387_s28 }
 0x267   : > { %s2056_s28 = smov %s1518_s17  ;;  %s2057_s29 = smov %s1399_s6 }
 0x268   : > { %s2058_s30 = smov %s1403_s7  ;;  %27 = sbr.rel (!%p25_p3) target bundleno = 30 (0x1e), region = 75 }
 0x26a   : > { %s2059_s6 = smov %s2052_s13 }
 0x26b   : > { %s2060_s7 = smov %s2053_s0 }
 0x26d   :  { %942 = vsyncpa [#allocation6], 1 }
 0x26e   :  { %944 = vsyncpa [#allocation6 + $0x1], 1 }

</bundles_post_ra>
